<compile_context>
chip_gen: v7x
topology: tpu7x:2x2x1
jax: 0.10.0
libtpu: 0.0.40
codegen_flags: <defaults>
</compile_context>

<pallas_src>
import functools

import jax
import jax.numpy as jnp
from jax.experimental import pallas as pl
from jax.experimental.pallas import tpu as pltpu


def _disc_kernel(x_ref, w1_ref, b1_ref, w2_ref, b2_ref, g_ref, beta_ref,
                 w3_ref, b3_ref, o_ref):
    # x_ref: (TM, E)  w1: (E, H)  w2: (H, H)  b1/b2/g/beta: (1, H)
    # w3: (H, 128) zero-padded past num_class   b3: (1, 128) with -1e9 padding
    # o_ref: (TM, 128)
    x = x_ref[...]  # keep native dtype (bf16 stays bf16 for the MXU)

    # Linear 1 -> Linear 2 (no activation in between, as in the module).
    h = jnp.dot(x, w1_ref[...], preferred_element_type=jnp.float32) + b1_ref[...]
    h = jnp.dot(h, w2_ref[...], preferred_element_type=jnp.float32) + b2_ref[...]

    # ReLU
    h = jnp.maximum(h, 0.0)

    # LayerNorm over hidden dim (eps matches nn.LayerNorm default 1e-5).
    # Single pass: var = E[h^2] - mu^2; fuse gamma into the rsqrt scale.
    mu = jnp.mean(h, axis=-1, keepdims=True)
    msq = jnp.mean(h * h, axis=-1, keepdims=True)
    var = msq - mu * mu
    scale = jax.lax.rsqrt(var + 1e-5) * g_ref[...]
    hn = (h - mu) * scale + beta_ref[...]

    # Dropout: identity (eval mode).
    # TODO(synk): training-mode dropout not implemented.

    # Classifier (lane-padded) + softmax. Padded columns have logits ~ -1e9
    # so their probabilities are exactly 0 and real classes still sum to 1.
    logits = jnp.dot(hn, w3_ref[...], preferred_element_type=jnp.float32) + b3_ref[...]
    mx = jnp.max(logits, axis=-1, keepdims=True)
    e = jnp.exp(logits - mx)
    denom = jnp.sum(e, axis=-1, keepdims=True)
    p = e * pl.reciprocal(denom, approx=False)  # EUP reciprocal, tight enough for 1e-5 tol
    o_ref[...] = p.astype(o_ref.dtype)


def _round_up(x, n):
    return ((x + n - 1) // n) * n


@functools.partial(jax.jit, static_argnames=("tm",))
def global_discriminator(sent_vec, params, tm=1024):
    """sent_vec: (..., emb_size) -> (..., num_class) softmax probabilities."""
    w1, b1, w2, b2, gamma, beta, w3, b3 = (
        params["w1"], params["b1"], params["w2"], params["b2"],
        params["gamma"], params["beta"], params["w3"], params["b3"],
    )
    emb = sent_vec.shape[-1]
    hid = w1.shape[1]
    ncls = w3.shape[1]
    lanes = 128  # lane-dense output width

    lead = sent_vec.shape[:-1]
    x = sent_vec.reshape(-1, emb)
    m = x.shape[0]

    # Lane-pad the classifier: zero weight columns + large-negative bias make
    # padded logits vanish under softmax while the store stays full-lane.
    w3p = jnp.zeros((hid, lanes), w3.dtype).at[:, :ncls].set(w3)
    b3p = jnp.full((1, lanes), -1e9, b3.dtype).at[:, :ncls].set(b3)

    # Row-tile choice: as large as possible while double-buffered activations
    # fit a conservative VMEM budget (v7x: 64 MiB physical, 32 MiB scoped).
    x_bytes = x.dtype.itemsize
    o_bytes = sent_vec.dtype.itemsize
    budget = 20 * 1024 * 1024
    tm_eff = min(_round_up(max(tm, 8), 8), m)
    while tm_eff > 8 and 2 * tm_eff * (emb * x_bytes + lanes * o_bytes) > budget:
        tm_eff = max(8, _round_up(tm_eff // 2, 8))

    # No jnp.pad copy of x: ragged last block handled by Pallas (OOB writes dropped).
    grid = (pl.cdiv(m, tm_eff),)

    flops = 2 * m * (emb * hid + hid * hid + hid * lanes)
    transcendentals = m * (lanes + 2)
    bytes_accessed = (
        m * emb * x_bytes + m * lanes * o_bytes
        + sum(int(a.size) * a.dtype.itemsize
              for a in (w1, b1, w2, b2, gamma, beta, w3p, b3p)))

    out = pl.pallas_call(
        _disc_kernel,
        out_shape=jax.ShapeDtypeStruct((m, lanes), sent_vec.dtype),
        grid_spec=pltpu.PrefetchScalarGridSpec(
            num_scalar_prefetch=0,
            grid=grid,
            in_specs=[
                pl.BlockSpec((tm_eff, emb), lambda i: (i, 0)),
                pl.BlockSpec((emb, hid), lambda i: (0, 0)),
                pl.BlockSpec((1, hid), lambda i: (0, 0)),
                pl.BlockSpec((hid, hid), lambda i: (0, 0)),
                pl.BlockSpec((1, hid), lambda i: (0, 0)),
                pl.BlockSpec((1, hid), lambda i: (0, 0)),
                pl.BlockSpec((1, hid), lambda i: (0, 0)),
                pl.BlockSpec((hid, lanes), lambda i: (0, 0)),
                pl.BlockSpec((1, lanes), lambda i: (0, 0)),
            ],
            out_specs=pl.BlockSpec((tm_eff, lanes), lambda i: (i, 0)),
        ),
        compiler_params=pltpu.CompilerParams(
            dimension_semantics=("parallel",),
            vmem_limit_bytes=32 * 1024 * 1024,
        ),
        cost_estimate=pl.CostEstimate(
            flops=flops,
            transcendentals=transcendentals,
            bytes_accessed=bytes_accessed,
        ),
    )(x, w1, b1, w2, b2, gamma, beta, w3p, b3p)

    return out[:, :ncls].reshape(*lead, ncls)


def init_params(key, emb_size, hidden_size=32, num_class=2, dtype=jnp.float32):
    """Parameter init mirroring the nn.Module layer shapes (weights as (in, out))."""
    ks = jax.random.split(key, 6)
    s1 = 1.0 / (emb_size ** 0.5)
    s2 = 1.0 / (hidden_size ** 0.5)
    w1 = jax.random.uniform(ks[0], (emb_size, hidden_size), dtype, -s1, s1)
    b1 = jax.random.uniform(ks[1], (1, hidden_size), dtype, -s1, s1)
    w2 = jax.random.uniform(ks[2], (hidden_size, hidden_size), dtype, -s2, s2)
    b2 = jax.random.uniform(ks[3], (1, hidden_size), dtype, -s2, s2)
    w3 = jax.random.uniform(ks[4], (hidden_size, num_class), dtype, -s2, s2)
    b3 = jax.random.uniform(ks[5], (1, num_class), dtype, -s2, s2)
    gamma = jnp.ones((1, hidden_size), dtype)   # LayerNorm weight
    beta = jnp.zeros((1, hidden_size), dtype)   # LayerNorm bias
    return dict(w1=w1, b1=b1, w2=w2, b2=b2, gamma=gamma, beta=beta, w3=w3, b3=b3)


def _reference(sent_vec, params):
    x = sent_vec.astype(jnp.float32)
    h = x @ params["w1"].astype(jnp.float32) + params["b1"]
    h = h @ params["w2"] + params["b2"]
    h = jnp.maximum(h, 0.0)
    mu = jnp.mean(h, axis=-1, keepdims=True)
    var = jnp.mean((h - mu) ** 2, axis=-1, keepdims=True)
    hn = (h - mu) / jnp.sqrt(var + 1e-5) * params["gamma"] + params["beta"]
    logits = hn @ params["w3"] + params["b3"]
    return jax.nn.softmax(logits, axis=-1).astype(sent_vec.dtype)


if __name__ == "__main__":
    dropout = 0.1
    emb_size = 32
    seq_len = 9          # module stores seq_len - 1; unused in forward
    num_class = 2

    key = jax.random.PRNGKey(0)
    kp, kx, kp2, kx2 = jax.random.split(key, 4)

    # Small sanity check: (batch, emb) sentence vectors.
    params = init_params(kp, emb_size)
    sent_vec = jax.random.normal(kx, (4, emb_size), jnp.float32)
    out = jax.block_until_ready(global_discriminator(sent_vec, params))
    ref = _reference(sent_vec, params)
    assert out.shape == (4, num_class), out.shape
    assert jnp.allclose(out, ref, atol=1e-5, rtol=1e-5), "mismatch vs reference"
    assert jnp.allclose(jnp.sum(out, axis=-1), 1.0, atol=1e-5)

    # Larger multi-tile check with a ragged last block (300 rows, tm=128).
    emb2 = 64
    params2 = init_params(kp2, emb2)
    big = jax.random.normal(kx2, (3, 100, emb2), jnp.float32)
    out2 = jax.block_until_ready(global_discriminator(big, params2, tm=128))
    ref2 = _reference(big, params2)
    assert out2.shape == (3, 100, num_class), out2.shape
    assert jnp.allclose(out2, ref2, atol=1e-5, rtol=1e-5), "mismatch vs reference (ragged)"
    assert jnp.allclose(jnp.sum(out2, axis=-1), 1.0, atol=1e-5)

    print("KERNEL_OK")
</pallas_src>

<mosaic_0001>
module attributes {stable_mosaic.version = 11 : i64} {
  func.func @_disc_kernel(%arg0: i32, %arg1: memref<4x32xf32, #tpu.memory_space<vmem>>, %arg2: memref<32x32xf32, #tpu.memory_space<vmem>>, %arg3: memref<1x32xf32, #tpu.memory_space<vmem>>, %arg4: memref<32x32xf32, #tpu.memory_space<vmem>>, %arg5: memref<1x32xf32, #tpu.memory_space<vmem>>, %arg6: memref<1x32xf32, #tpu.memory_space<vmem>>, %arg7: memref<1x32xf32, #tpu.memory_space<vmem>>, %arg8: memref<32x128xf32, #tpu.memory_space<vmem>>, %arg9: memref<1x128xf32, #tpu.memory_space<vmem>>, %arg10: memref<4x128xf32, #tpu.memory_space<vmem>>) attributes {dimension_semantics = [#tpu.dimension_semantics<parallel>], iteration_bounds = array<i64: 1>, scalar_prefetch = 0 : i64, scratch_operands = 0 : i64, tpu.core_type = #tpu.core_type<tc>, window_params = [{transform_indices = @transform_0, window_bounds = array<i64: 4, 32>}, {pipeline_mode = #tpu.pipeline_mode<synchronous>, transform_indices = @transform_1, window_bounds = array<i64: 32, 32>}, {pipeline_mode = #tpu.pipeline_mode<synchronous>, transform_indices = @transform_2, window_bounds = array<i64: 1, 32>}, {pipeline_mode = #tpu.pipeline_mode<synchronous>, transform_indices = @transform_3, window_bounds = array<i64: 32, 32>}, {pipeline_mode = #tpu.pipeline_mode<synchronous>, transform_indices = @transform_4, window_bounds = array<i64: 1, 32>}, {pipeline_mode = #tpu.pipeline_mode<synchronous>, transform_indices = @transform_5, window_bounds = array<i64: 1, 32>}, {pipeline_mode = #tpu.pipeline_mode<synchronous>, transform_indices = @transform_6, window_bounds = array<i64: 1, 32>}, {pipeline_mode = #tpu.pipeline_mode<synchronous>, transform_indices = @transform_7, window_bounds = array<i64: 32, 128>}, {pipeline_mode = #tpu.pipeline_mode<synchronous>, transform_indices = @transform_8, window_bounds = array<i64: 1, 128>}, {transform_indices = @transform_9, window_bounds = array<i64: 4, 128>}]} {
    %c0 = arith.constant 0 : index
    %c0_0 = arith.constant 0 : index
    %0 = vector.load %arg1[%c0, %c0_0] : memref<4x32xf32, #tpu.memory_space<vmem>>, vector<4x32xf32>
    %c0_1 = arith.constant 0 : index
    %c0_2 = arith.constant 0 : index
    %1 = vector.load %arg2[%c0_1, %c0_2] : memref<32x32xf32, #tpu.memory_space<vmem>>, vector<32x32xf32>
    %cst = arith.constant dense<0.000000e+00> : vector<4x32xf32>
    %2 = tpu.matmul %0, %1, %cst {dimension_numbers = #tpu.dot_dimension_numbers<[1], [0], [0], [1], [0, 0, 1, 1], [], []>} : vector<4x32xf32>, vector<32x32xf32>, vector<4x32xf32> -> vector<4x32xf32>
    %c0_3 = arith.constant 0 : index
    %c0_4 = arith.constant 0 : index
    %3 = vector.load %arg3[%c0_3, %c0_4] : memref<1x32xf32, #tpu.memory_space<vmem>>, vector<1x32xf32>
    %4 = vector.broadcast %3 : vector<1x32xf32> to vector<4x32xf32>
    %5 = arith.addf %2, %4 : vector<4x32xf32>
    %c0_5 = arith.constant 0 : index
    %c0_6 = arith.constant 0 : index
    %6 = vector.load %arg4[%c0_5, %c0_6] : memref<32x32xf32, #tpu.memory_space<vmem>>, vector<32x32xf32>
    %cst_7 = arith.constant dense<0.000000e+00> : vector<4x32xf32>
    %7 = tpu.matmul %5, %6, %cst_7 {dimension_numbers = #tpu.dot_dimension_numbers<[1], [0], [0], [1], [0, 0, 1, 1], [], []>} : vector<4x32xf32>, vector<32x32xf32>, vector<4x32xf32> -> vector<4x32xf32>
    %c0_8 = arith.constant 0 : index
    %c0_9 = arith.constant 0 : index
    %8 = vector.load %arg5[%c0_8, %c0_9] : memref<1x32xf32, #tpu.memory_space<vmem>>, vector<1x32xf32>
    %9 = vector.broadcast %8 : vector<1x32xf32> to vector<4x32xf32>
    %10 = arith.addf %7, %9 : vector<4x32xf32>
    %cst_10 = arith.constant 0.000000e+00 : f32
    %11 = vector.broadcast %cst_10 : f32 to vector<4x32xf32>
    %12 = arith.maximumf %10, %11 : vector<4x32xf32>
    %cst_11 = arith.constant dense<0.000000e+00> : vector<4xf32>
    %13 = vector.multi_reduction <add>, %12, %cst_11 [1] : vector<4x32xf32> to vector<4xf32>
    %14 = vector.shape_cast %13 : vector<4xf32> to vector<4x1xf32>
    %cst_12 = arith.constant 3.200000e+01 : f32
    %15 = vector.broadcast %cst_12 : f32 to vector<4x1xf32>
    %16 = arith.divf %14, %15 : vector<4x1xf32>
    %17 = arith.mulf %12, %12 : vector<4x32xf32>
    %cst_13 = arith.constant dense<0.000000e+00> : vector<4xf32>
    %18 = vector.multi_reduction <add>, %17, %cst_13 [1] : vector<4x32xf32> to vector<4xf32>
    %19 = vector.shape_cast %18 : vector<4xf32> to vector<4x1xf32>
    %cst_14 = arith.constant 3.200000e+01 : f32
    %20 = vector.broadcast %cst_14 : f32 to vector<4x1xf32>
    %21 = arith.divf %19, %20 : vector<4x1xf32>
    %22 = arith.mulf %16, %16 : vector<4x1xf32>
    %23 = arith.subf %21, %22 : vector<4x1xf32>
    %cst_15 = arith.constant 9.99999974E-6 : f32
    %24 = vector.broadcast %cst_15 : f32 to vector<4x1xf32>
    %25 = arith.addf %23, %24 : vector<4x1xf32>
    %26 = math.rsqrt %25 : vector<4x1xf32>
    %c0_16 = arith.constant 0 : index
    %c0_17 = arith.constant 0 : index
    %27 = vector.load %arg6[%c0_16, %c0_17] : memref<1x32xf32, #tpu.memory_space<vmem>>, vector<1x32xf32>
    %28 = vector.broadcast %26 : vector<4x1xf32> to vector<4x32xf32>
    %29 = vector.broadcast %27 : vector<1x32xf32> to vector<4x32xf32>
    %30 = arith.mulf %28, %29 : vector<4x32xf32>
    %31 = vector.broadcast %16 : vector<4x1xf32> to vector<4x32xf32>
    %32 = arith.subf %12, %31 : vector<4x32xf32>
    %33 = arith.mulf %32, %30 : vector<4x32xf32>
    %c0_18 = arith.constant 0 : index
    %c0_19 = arith.constant 0 : index
    %34 = vector.load %arg7[%c0_18, %c0_19] : memref<1x32xf32, #tpu.memory_space<vmem>>, vector<1x32xf32>
    %35 = vector.broadcast %34 : vector<1x32xf32> to vector<4x32xf32>
    %36 = arith.addf %33, %35 : vector<4x32xf32>
    %c0_20 = arith.constant 0 : index
    %c0_21 = arith.constant 0 : index
    %37 = vector.load %arg8[%c0_20, %c0_21] : memref<32x128xf32, #tpu.memory_space<vmem>>, vector<32x128xf32>
    %cst_22 = arith.constant dense<0.000000e+00> : vector<4x128xf32>
    %38 = tpu.matmul %36, %37, %cst_22 {dimension_numbers = #tpu.dot_dimension_numbers<[1], [0], [0], [1], [0, 0, 1, 1], [], []>} : vector<4x32xf32>, vector<32x128xf32>, vector<4x128xf32> -> vector<4x128xf32>
    %c0_23 = arith.constant 0 : index
    %c0_24 = arith.constant 0 : index
    %39 = vector.load %arg9[%c0_23, %c0_24] : memref<1x128xf32, #tpu.memory_space<vmem>>, vector<1x128xf32>
    %40 = vector.broadcast %39 : vector<1x128xf32> to vector<4x128xf32>
    %41 = arith.addf %38, %40 : vector<4x128xf32>
    %cst_25 = arith.constant dense<0xFF800000> : vector<4xf32>
    %42 = vector.multi_reduction <maximumf>, %41, %cst_25 [1] : vector<4x128xf32> to vector<4xf32>
    %43 = vector.shape_cast %42 : vector<4xf32> to vector<4x1xf32>
    %44 = vector.broadcast %43 : vector<4x1xf32> to vector<4x128xf32>
    %45 = arith.subf %41, %44 : vector<4x128xf32>
    %46 = math.exp %45 : vector<4x128xf32>
    %cst_26 = arith.constant dense<0.000000e+00> : vector<4xf32>
    %47 = vector.multi_reduction <add>, %46, %cst_26 [1] : vector<4x128xf32> to vector<4xf32>
    %48 = vector.shape_cast %47 : vector<4xf32> to vector<4x1xf32>
    %49 = tpu.reciprocal %48 : vector<4x1xf32> -> vector<4x1xf32>
    %50 = vector.broadcast %49 : vector<4x1xf32> to vector<4x128xf32>
    %51 = arith.mulf %46, %50 : vector<4x128xf32>
    %c0_27 = arith.constant 0 : index
    %c0_28 = arith.constant 0 : index
    %52 = vector.load %arg10[%c0_27, %c0_28] : memref<4x128xf32, #tpu.memory_space<vmem>>, vector<4x128xf32>
    tpu.vector_store %arg10[%c0_27, %c0_28], %51 {strides = array<i32>} : memref<4x128xf32, #tpu.memory_space<vmem>>, vector<4x128xf32>,
    return
  }
  func.func @transform_0(%arg0: i32) -> (i32, i32) {
    %c0_i32 = arith.constant 0 : i32
    %c0_i32_0 = arith.constant 0 : i32
    return %arg0, %c0_i32 : i32, i32
  }
  func.func @transform_1(%arg0: i32) -> (i32, i32) {
    %c0_i32 = arith.constant 0 : i32
    %c0_i32_0 = arith.constant 0 : i32
    %c0_i32_1 = arith.constant 0 : i32
    return %c0_i32, %c0_i32_0 : i32, i32
  }
  func.func @transform_2(%arg0: i32) -> (i32, i32) {
    %c0_i32 = arith.constant 0 : i32
    %c0_i32_0 = arith.constant 0 : i32
    %c0_i32_1 = arith.constant 0 : i32
    return %c0_i32, %c0_i32_0 : i32, i32
  }
  func.func @transform_3(%arg0: i32) -> (i32, i32) {
    %c0_i32 = arith.constant 0 : i32
    %c0_i32_0 = arith.constant 0 : i32
    %c0_i32_1 = arith.constant 0 : i32
    return %c0_i32, %c0_i32_0 : i32, i32
  }
  func.func @transform_4(%arg0: i32) -> (i32, i32) {
    %c0_i32 = arith.constant 0 : i32
    %c0_i32_0 = arith.constant 0 : i32
    %c0_i32_1 = arith.constant 0 : i32
    return %c0_i32, %c0_i32_0 : i32, i32
  }
  func.func @transform_5(%arg0: i32) -> (i32, i32) {
    %c0_i32 = arith.constant 0 : i32
    %c0_i32_0 = arith.constant 0 : i32
    %c0_i32_1 = arith.constant 0 : i32
    return %c0_i32, %c0_i32_0 : i32, i32
  }
  func.func @transform_6(%arg0: i32) -> (i32, i32) {
    %c0_i32 = arith.constant 0 : i32
    %c0_i32_0 = arith.constant 0 : i32
    %c0_i32_1 = arith.constant 0 : i32
    return %c0_i32, %c0_i32_0 : i32, i32
  }
  func.func @transform_7(%arg0: i32) -> (i32, i32) {
    %c0_i32 = arith.constant 0 : i32
    %c0_i32_0 = arith.constant 0 : i32
    %c0_i32_1 = arith.constant 0 : i32
    return %c0_i32, %c0_i32_0 : i32, i32
  }
  func.func @transform_8(%arg0: i32) -> (i32, i32) {
    %c0_i32 = arith.constant 0 : i32
    %c0_i32_0 = arith.constant 0 : i32
    %c0_i32_1 = arith.constant 0 : i32
    return %c0_i32, %c0_i32_0 : i32, i32
  }
  func.func @transform_9(%arg0: i32) -> (i32, i32) {
    %c0_i32 = arith.constant 0 : i32
    %c0_i32_0 = arith.constant 0 : i32
    return %arg0, %c0_i32 : i32, i32
  }
}

</mosaic_0001>

<bundles_post_ra>
// kernel: global_discriminator.1
= control target key start
LH: loop header
LB: loop body
LE: loop exit
PB: predicated region body
PF: predicated region fallthrough
CT: control target
= control target key end

     0   :  { %v420_v0 = vmov 0.0|0.0   ;;  %vm421_vm0 = vmmov 0   ;;  %v422_v4 = vmov 0.0   ;;  %vm44_vm1 = vcmask 261120   ;;  %s536_s1 = inlined_call_operand.vmem [shape: f32[32,32], index: 1, kind: input, shape index: {}]   ;;  %s537_s3 = inlined_call_operand.vmem [shape: f32[32,32], index: 3, kind: input, shape index: {}]   ;;  %s538_s0 = inlined_call_operand.vmem [shape: f32[4,32], index: 0, kind: input, shape index: {}]   ;;  %s539_s2 = inlined_call_operand.vmem [shape: f32[1,32], index: 2, kind: input, shape index: {}]   ;;  %s540_s4 = inlined_call_operand.vmem [shape: f32[1,32], index: 4, kind: input, shape index: {}]   ;;  %s541_s7 = inlined_call_operand.vmem [shape: f32[32,128], index: 7, kind: input, shape index: {}]   ;;  %s542_s5 = inlined_call_operand.vmem [shape: f32[1,32], index: 5, kind: input, shape index: {}]   ;;  %s543_s6 = inlined_call_operand.vmem [shape: f32[1,32], index: 6, kind: input, shape index: {}]   ;;  %s544_s8 = inlined_call_operand.vmem [shape: f32[1,128], index: 8, kind: input, shape index: {}]   ;;  %s545_s9 = inlined_call_operand.vmem [shape: f32[4,128], index: 9, kind: output, shape index: {}]  }
   0x1   :  { %393 = vmatprep.subr.bf16.mxu0 %v420_v0  ;;  %v33_v1 = vld [vmem:[%s536_s1] sm:$0xff]  ;;  %v34_v2 = vld [vmem:[%s536_s1 + $0x8] sm:$0xff]  ;;  %v35_v3 = vld [vmem:[%s536_s1 + $0x10] sm:$0xff]  ;;  %368 = vmatprep.mubr.msk.f32.mxu0 %vm421_vm0, %v422_v4  ;;  %vm203_vm2 = vcmask 257024   ;;  %vm320_vm3 = vcmask 1043456  }
   0x2   :  { %v394_v5 = vpack.c.bf16 %v34_v2, %v33_v1  ;;  %v36_v6 = vld [vmem:[%s536_s1 + $0x18] sm:$0xff]  ;;  %399 = vmatprep.subr.bf16.mxu1 %v420_v0  ;;  %v118_v7 = vld [vmem:[%s537_s3] sm:$0xff]  ;;  %379 = vmatprep.mubr.msk.f32.mxu1 %vm421_vm0, %v422_v4  ;;  %v119_v8 = vld [vmem:[%s537_s3 + $0x8] sm:$0xff] }
   0x3   :  { %v397_v9 = vpack.c.bf16 %v36_v6, %v35_v3  ;;  %v400_v10 = vpack.c.bf16 %v119_v8, %v118_v7  ;;  %v32_v11 = vld [vmem:[%s538_s0] sm:$0xf]  ;;  %v120_v12 = vld [vmem:[%s537_s3 + $0x10] sm:$0xff]  ;;  %v121_v13 = vld [vmem:[%s537_s3 + $0x18] sm:$0xff] }
   0x4   :  { %395 = vmatpush3.bf16.msra.mxu0 %v394_v5  ;;  %v403_v14 = vpack.c.bf16 %v121_v13, %v120_v12  ;;  %v337_v15 = vld [vmem:[%s539_s2] ss:$0 sm:$0xff]  ;;  %v237_v28 = vld [vmem:[%s541_s7 + $0x8] sm:$0xff]  ;;  %v238_v30 = vld [vmem:[%s541_s7 + $0x10] sm:$0xff] }
   0x5   :  { %396 = vmatprep.subr.bf16.mxu0 %v420_v0  ;;  %401 = vmatpush3.bf16.msra.mxu1 %v400_v10  ;;  %v339_v19 = vld [vmem:[%s540_s4] ss:$0 sm:$0xff]  ;;  %v239_v31 = vld [vmem:[%s541_s7 + $0x18] sm:$0xff] }
   0x6   :  { %402 = vmatprep.subr.bf16.mxu1 %v420_v0  ;;  %v236_v27 = vld [vmem:[%s541_s7] sm:$0xff]  ;;  %v409_v32 = vpack.c.bf16 %v239_v31, %v238_v30 }
   0x7   :  { %v406_v29 = vpack.c.bf16 %v237_v28, %v236_v27  ;;  %v341_v40 = vld [vmem:[%s542_s5] ss:$0 sm:$0xff] }
   0x8   :  { %398 = vmatpush3.bf16.msra.mxu0 %v397_v9  ;;  %v342_v44 = vld [vmem:[%s543_s6] ss:$0 sm:$0xff] }
   0x9   :  { %405 = vmatprep.subr.bf16.mxu0 %v420_v0  ;;  %404 = vmatpush3.bf16.msra.mxu1 %v403_v14  ;;  %v343_v47 = vld [vmem:[%s544_s8] ss:$0 sm:$0xff] }
   0xb   :  { %369 = vmatmul.mubr.msk.f32.vlgmr.msra.gmra.mrb[0].mxu0 %vm44_vm1, %v32_v11 }
   0xc   :  { %390 = vmatprep.mubr.msk.f32.mxu0 %vm421_vm0, %v422_v4  ;;  %407 = vmatpush3.bf16.msra.mxu0 %v406_v29 }
   0xd   :  { %408 = vmatprep.subr.bf16.mxu0 %v420_v0 }
  0x10   :  { %410 = vmatpush3.bf16.msra.mxu0 %v409_v32 }
  0xde   :  { %v114_v16 = vpop.f32.mrb[0].mxu0 }
  0xdf   :  { %v115_v17 = vadd.f32 %v337_v15, %v114_v16  ;;  %v370_v18 = vpop.f32.mrb[1].mxu0 }
  0xe1   :  { %380 = vmatmul.mubr.msk.f32.vlgmr.msra.gmra.mrb[0].mxu1 %vm44_vm1, %v115_v17 }
 0x1b4   :  { %v198_v20 = vpop.f32.mrb[0].mxu1 }
 0x1b5   :  { %v199_v21 = vadd.f32 %v339_v19, %v198_v20  ;;  %v381_v22 = vpop.f32.mrb[1].mxu1 }
 0x1b7   :  { %v202_v23 = vmax.f32 %v199_v21, 0.0 }
 0x1b9   :  { %v204_v24 = vsel %vm203_vm2, %v202_v23, 0.0  ;;  %v209_v25 = vmul.f32 %v202_v23, %v202_v23 }
 0x1ba   :  { %205 = vadd.xlane.f32.xlu0 %v204_v24 }
 0x1bb   :  { %v210_v26 = vsel %vm203_vm2, %v209_v25, 0.0 }
 0x1be   :  { %211 = vadd.xlane.f32.xlu0 %v210_v26 }
 0x247   :  { %v206_v33 = vpop.xlane.xlu0 %205 }
 0x248   :  { %v208_v34 = vmul.f32 0.03125, %v206_v33 }
 0x24a   :  { %v214_v36 = vmul.f32 %v208_v34, %v208_v34  ;;  %v226_v42 = vsub.f32 %v202_v23, %v208_v34 }
 0x24b   :  { %v212_v35 = vpop.xlane.xlu0 %211 }
 0x24c   :  { %v213_v37 = vmul.f32 0.03125, %v212_v35 }
 0x24e   :  { %v215_v38 = vsub.f32 %v213_v37, %v214_v36 }
 0x250   :  { %v216_v39 = vadd.f32 1e-05, %v215_v38 }
 0x252   :  { %414 = vrsqrt.f32 %v216_v39 }
 0x25c   :  { %v415_v41 = vpop.eup %414 }
 0x25d   :  { %v225_v43 = vmul.f32 %v415_v41, %v341_v40 }
 0x25f   :  { %v227_v45 = vmul.f32 %v226_v42, %v225_v43 }
 0x261   :  { %v235_v46 = vadd.f32 %v342_v44, %v227_v45 }
 0x263   :  { %391 = vmatmul.mubr.msk.f32.vlgmr.msra.gmra.mrb[2].mxu0 %vm44_vm1, %v235_v46 }
 0x336   :  { %v316_v48 = vpop.f32.mrb[2].mxu0 }
 0x337   :  { %v317_v49 = vadd.f32 %v343_v47, %v316_v48  ;;  %v392_v50 = vpop.f32.mrb[3].mxu0 }
 0x339   :  { %v321_v51 = vsel %vm320_vm3, %v317_v49, -inf }
 0x33a   :  { %322 = vmax.xlane.f32.xlu1 %v321_v51 }
 0x3c7   :  { %v323_v52 = vpop.xlane.xlu1 %322 }
 0x3c8   :  { %v324_v53 = vsub.f32 %v317_v49, %v323_v52 }
 0x3ca   :  { %v325_v54 = vmul.f32 1.442695, %v324_v53 }
 0x3cc   :  { %416 = vpow2.f32 %v325_v54 }
 0x3d6   :  { %v417_v55 = vpop.eup %416 }
 0x3d7   :  { %v327_v56 = vsel %vm320_vm3, %v417_v55, 0.0 }
 0x3d8   :  { %328 = vadd.xlane.f32.xlu1 %v327_v56 }
 0x465   :  { %v329_v57 = vpop.xlane.xlu1 %328 }
 0x466   :  { %418 = vrcp.f32 %v329_v57 }
 0x470   :  { %v419_v58 = vpop.eup %418 }
 0x471   :  { %v331_v59 = vmul.f32 %v419_v58, %v417_v55 }
 0x473   :  { %332 = vst [vmem:[%s545_s9] sm:$0xf] %v331_v59 }

</bundles_post_ra>
